<compile_context>
chip_gen: v5e
topology: v5e:2x2
jax: 0.10.0
libtpu: 0.0.40
codegen_flags: <defaults>
</compile_context>

<pallas_src>
import jax
import jax.numpy as jnp
from jax.experimental import pallas as pl
from jax.experimental.pallas import tpu as pltpu

# Deterministic "architecture params" (would come from model_architecture_params)
INITIALIZE_WITH_TRUE_STATE = True
INITIAL_POSITION_STD = 0.25

# Toy shapes for the checked run.
B = 2    # batch
N = 16   # number of particles
D = 4    # state dimension

_LANES = 128                      # lane width; last dim of every tile
_BLOCK_ROWS = 2048                # (2048, 128) f32 tile = 1 MiB per buffer
_PALLAS_MIN_ELEMS = 128 * 1024    # below this, XLA-fused op beats kernel launch


def _init_particles_kernel(ts_ref, noise_ref, part_ref):
    # ts_ref   : VMEM [tile_rows, 128] f32 -- pre-broadcast true_state (lane-dense)
    # noise_ref: VMEM [tile_rows, 128] f32 -- standard-normal noise
    # part_ref : VMEM [tile_rows, 128]     -- output particles (f32 or bf16)
    # One fused multiply-add per vreg; cast only on store (no-op for f32 out).
    ts = ts_ref[...]
    nz = noise_ref[...]
    part_ref[...] = (ts + jnp.float32(INITIAL_POSITION_STD) * nz).astype(part_ref.dtype)


def _particles_pallas(ts2, nz2, out_dtype):
    rows = ts2.shape[0]
    if rows <= _BLOCK_ROWS:
        # Small / toy sizes: single invocation, whole arrays resident in VMEM.
        return pl.pallas_call(
            _init_particles_kernel,
            out_shape=jax.ShapeDtypeStruct((rows, _LANES), out_dtype),
            in_specs=[
                pl.BlockSpec(memory_space=pltpu.MemorySpace.VMEM),
                pl.BlockSpec(memory_space=pltpu.MemorySpace.VMEM),
            ],
            out_specs=pl.BlockSpec(memory_space=pltpu.MemorySpace.VMEM),
        )(ts2, nz2)

    # Realistic-N path: BlockSpec auto-pipelining, 1 MiB lane-dense tiles,
    # grid axis "parallel" so v7x's 2 TensorCores shard it (no-op on v5e/v6e).
    spec = pl.BlockSpec((_BLOCK_ROWS, _LANES), lambda i: (i, 0))
    return pl.pallas_call(
        _init_particles_kernel,
        out_shape=jax.ShapeDtypeStruct((rows, _LANES), out_dtype),
        grid=(pl.cdiv(rows, _BLOCK_ROWS),),
        in_specs=[spec, spec],
        out_specs=spec,
        compiler_params=pltpu.CompilerParams(
            dimension_semantics=("parallel",)),
    )(ts2, nz2)


def create_initial_dpf_state(true_state, noise, *, out_dtype=jnp.float32,
                             force_pallas=False):
    """true_state: [B, D] f32, noise: [B, N, D] f32
       -> (particles [B, N, D] out_dtype, weights [B, N] f32)."""
    b, d = true_state.shape
    bn, n, dn = noise.shape
    assert (bn, dn) == (b, d)
    total = b * n * d
    std = jnp.float32(INITIAL_POSITION_STD)

    # Uniform particle weights: compile-time constant, emitted outside the kernel.
    weights = jnp.full((b, n), 1.0 / n, dtype=jnp.float32)

    # Tiny problems (or lane-unaligned totals): let XLA fuse the FMA; a
    # pallas_call costs microseconds of launch + DMA setup for a few vregs.
    if (total % _LANES != 0) or (total < _PALLAS_MIN_ELEMS and not force_pallas):
        particles = (true_state[:, None, :] + std * noise).astype(out_dtype)
        return particles, weights

    # Layout plumbing in the wrapper (not compute): pre-broadcast true_state
    # over the particle axis and flatten both operands lane-dense.
    rows = total // _LANES
    ts2 = jnp.broadcast_to(true_state[:, None, :], (b, n, d)).reshape(rows, _LANES)
    nz2 = noise.reshape(rows, _LANES)

    particles = _particles_pallas(ts2, nz2, out_dtype).reshape(b, n, d)
    return particles, weights


if __name__ == "__main__":
    key = jax.random.PRNGKey(0)
    k_state, k_noise, k_state2, k_noise2 = jax.random.split(key, 4)

    # --- Toy-size check (forces the single-invocation Pallas path) ----------
    true_state = jax.random.normal(k_state, (B, D), dtype=jnp.float32)
    noise = jax.random.normal(k_noise, (B, N, D), dtype=jnp.float32)

    particles, weights = create_initial_dpf_state(true_state, noise,
                                                  force_pallas=True)
    particles = jax.block_until_ready(particles)
    weights = jax.block_until_ready(weights)

    ref_particles = true_state[:, None, :] + INITIAL_POSITION_STD * noise
    ref_weights = jnp.full((B, N), 1.0 / N, dtype=jnp.float32)
    assert jnp.allclose(particles, ref_particles, atol=1e-6, rtol=1e-6)
    assert jnp.allclose(weights, ref_weights, atol=1e-6, rtol=1e-6)

    # --- Larger check exercising the gridded, pipelined path ---------------
    B2, N2, D2 = 4, 32768, 4          # 524288 elems -> rows=4096 -> grid=(2,)
    true_state2 = jax.random.normal(k_state2, (B2, D2), dtype=jnp.float32)
    noise2 = jax.random.normal(k_noise2, (B2, N2, D2), dtype=jnp.float32)

    particles2, weights2 = create_initial_dpf_state(true_state2, noise2)
    particles2 = jax.block_until_ready(particles2)
    weights2 = jax.block_until_ready(weights2)

    ref_particles2 = true_state2[:, None, :] + INITIAL_POSITION_STD * noise2
    assert jnp.allclose(particles2, ref_particles2, atol=1e-6, rtol=1e-6)
    assert jnp.allclose(weights2,
                        jnp.full((B2, N2), 1.0 / N2, dtype=jnp.float32),
                        atol=1e-6, rtol=1e-6)

    print("KERNEL_OK")
</pallas_src>

<mosaic_0001>
module attributes {stable_mosaic.version = 11 : i64} {
  func.func @_init_particles_kernel(%arg0: memref<1x128xf32, #tpu.memory_space<vmem>>, %arg1: memref<1x128xf32, #tpu.memory_space<vmem>>, %arg2: memref<1x128xf32, #tpu.memory_space<vmem>>) attributes {dimension_semantics = [], scalar_prefetch = 0 : i64, scratch_operands = 0 : i64, tpu.core_type = #tpu.core_type<tc>} {
    %c0 = arith.constant 0 : index
    %c0_0 = arith.constant 0 : index
    %0 = vector.load %arg0[%c0, %c0_0] : memref<1x128xf32, #tpu.memory_space<vmem>>, vector<1x128xf32>
    %c0_1 = arith.constant 0 : index
    %c0_2 = arith.constant 0 : index
    %1 = vector.load %arg1[%c0_1, %c0_2] : memref<1x128xf32, #tpu.memory_space<vmem>>, vector<1x128xf32>
    %cst = arith.constant 2.500000e-01 : f32
    %2 = vector.broadcast %cst : f32 to vector<1x128xf32>
    %3 = arith.mulf %2, %1 : vector<1x128xf32>
    %4 = arith.addf %0, %3 : vector<1x128xf32>
    %c0_3 = arith.constant 0 : index
    %c0_4 = arith.constant 0 : index
    %5 = vector.load %arg2[%c0_3, %c0_4] : memref<1x128xf32, #tpu.memory_space<vmem>>, vector<1x128xf32>
    tpu.vector_store %arg2[%c0_3, %c0_4], %4 {strides = array<i32>} : memref<1x128xf32, #tpu.memory_space<vmem>>, vector<1x128xf32>,
    return
  }
}

</mosaic_0001>

<bundles_post_ra>
// kernel: tpu_custom_call.1
= control target key start
LH: loop header
LB: loop body
LE: loop exit
PB: predicated region body
PF: predicated region fallthrough
CT: control target
= control target key end

     0   :  { %7 = vsyncpa [#allocation3], 0  ;;  %s171_s0 = inlined_call_operand.hbm [shape: f32[1,128], index: 0, kind: input, shape index: {}]   ;;  %s172_s1 = inlined_call_operand.hbm [shape: f32[1,128], index: 1, kind: input, shape index: {}]   ;;  %s173_s2 = inlined_call_operand.hbm [shape: f32[1,128], index: 2, kind: output, shape index: {}]  }
   0x1   :  { %8 = vsyncpa [#allocation6], 0 }
   0x2   :  { %9 = vsyncpa [#allocation4], 0  ;;  %s15_s11 = sshll.u32 %s171_s0, 4  ;;  %s144_s12 = smov [#allocation2]   ;;  %s16_s11 = int_to_ptr.hbm [resolvable:$true] %s15_s11 }
   0x3   :  { %s17_s13 = sshll.u32 %s144_s12, 4  ;;  %s26_s16 = sshll.u32 %s172_s1, 4  ;;  %s18_s13 = int_to_ptr.vmem [resolvable:$true] %s17_s13  ;;  %s27_s16 = int_to_ptr.hbm [resolvable:$true] %s26_s16 }
   0x4   :  { %20 = dma.hbm_to_vmem [thread:$0]  %s16_s11, 16, %s18_s13, [#allocation3]  }
   0x5   :  { %s145_s17 = smov [#allocation5]  }
   0x6   :  { %s28_s18 = sshll.u32 %s145_s17, 4  ;;  %s29_s18 = int_to_ptr.vmem [resolvable:$true] %s28_s18 }
   0x7   :  { %31 = dma.hbm_to_vmem [thread:$0]  %s27_s16, 16, %s29_s18, [#allocation6]  }
   0x8   :  { %138 = dma.done.wait [#allocation3], 16  }
   0x9   :  { %139 = vsyncadd [#allocation3], 4294967280 }
   0xa   :  { %140 = dma.done.wait [#allocation6], 16  }
   0xb   :  { %141 = vsyncadd [#allocation6], 4294967280  ;;  %v40_v0 = vld [vmem:[#allocation2] sm:$0x1]  ;;  %v41_v1 = vld [vmem:[#allocation5] sm:$0x1] }
   0xc   :  { %s146_s0 = smov [#allocation7]   ;;  %s52_s22 = sshll.u32 %s173_s2, 4  ;;  %v42_v2 = vmul.f32 0.25, %v41_v1  ;;  %s53_s22 = int_to_ptr.hbm [resolvable:$true] %s52_s22 }
   0xd   :  { %s50_s19 = sshll.u32 %s146_s0, 4  ;;  %s51_s19 = int_to_ptr.vmem [resolvable:$true] %s50_s19 }
   0xe   :  { %v43_v3 = vadd.f32 %v42_v2, %v40_v0 }
  0x10   :  { %44 = vst [vmem:[#allocation7] sm:$0x1] %v43_v3 }
  0x11   :  { %55 = dma.vmem_to_hbm [thread:$0]  %s51_s19, 16, %s53_s22, [#allocation4]  }
  0x12   :  { %142 = dma.done.wait [#allocation4], 16  }
  0x13   :  { %143 = vsyncadd [#allocation4], 4294967280 }
  0x14   :  { %60 = vsyncpa [#allocation3], 1 }
  0x15   :  { %61 = vsyncpa [#allocation6], 1 }
  0x16   :  { %62 = vsyncpa [#allocation4], 1 }

</bundles_post_ra>
